<compile_context>
chip_gen: v6e
topology: v6e:2x2x1
jax: 0.10.0
libtpu: 0.0.40
codegen_flags: <defaults>
</compile_context>

<pallas_src>
import jax
import jax.numpy as jnp
from jax.experimental import pallas as pl
from jax.experimental.pallas import tpu as pltpu

_LANES = 128
_EPS_GIN = 0.0  # learn_eps = False  ->  eps stays 0


# ----------------------------------------------------------------------------
# Fused Pallas kernel: 2 GIN layers + prediction head
# ----------------------------------------------------------------------------
def _make_kernel(eps, cpad):
    one_plus_eps = 1.0 + eps

    def kernel(a_ref, h_ref, w1_ref, b1_ref, wpk_ref, b2_ref, out_ref):
        """a_ref  : (N, N)   bf16 row-normalized (masked, mean-aggr) adjacency
           h_ref  : (N, Din) f32 input node features
           w1_ref : (Din, H),  b1_ref : (1, H)        (BN folded in)
           wpk_ref: (H, 2*Cpad)  packed [W2 | Wpred], each zero-padded to Cpad
           b2_ref : (1, Cpad)                         (BN folded in, padded)
           out_ref: (N, Cpad)  0.5 * (h1 @ Wpred + h2); padded cols are zero
        """
        # ----- Layer 1:  h1 = relu(A @ (h W1) + (1+eps) (h W1) + b1) -----
        hw1 = jnp.dot(h_ref[...], w1_ref[...], preferred_element_type=jnp.float32)
        neigh1 = jnp.dot(a_ref[...], hw1.astype(jnp.bfloat16),
                         preferred_element_type=jnp.float32)
        h1 = jnp.maximum(neigh1 + one_plus_eps * hw1 + b1_ref[...], 0.0)

        # ----- Layer-2 pre-matmul fused with the prediction head:
        #       one K=H push producing 2*Cpad output lanes, split in-register.
        hw_pk = jnp.dot(h1, wpk_ref[...], preferred_element_type=jnp.float32)
        hw2 = hw_pk[:, :cpad]     # lane-aligned slice (Cpad multiple of 128)
        pred = hw_pk[:, cpad:]    # h1 @ Wpred  (linears_prediction, no bias)

        # ----- Layer 2:  h2 = relu(A @ (h1 W2) + (1+eps) (h1 W2) + b2) -----
        neigh2 = jnp.dot(a_ref[...], hw2.astype(jnp.bfloat16),
                         preferred_element_type=jnp.float32)
        h2 = jnp.maximum(neigh2 + one_plus_eps * hw2 + b2_ref[...], 0.0)

        # ----- Prediction head: (linears_prediction(h1) + h2) / 2 -----
        out_ref[...] = 0.5 * (pred + h2)

    return kernel


# ----------------------------------------------------------------------------
# One-time parameter preparation (outside the per-call hot path)
# ----------------------------------------------------------------------------
def _fold_bn(w, b, gamma, beta, mean, var, bn_eps=1e-5):
    """Fold eval-mode BatchNorm1d into the preceding Linear's weight/bias."""
    scale = gamma / jnp.sqrt(var + bn_eps)
    return w * scale[None, :], (b - mean) * scale + beta


def _pad_cols(x, to):
    pad = to - x.shape[-1]
    return jnp.pad(x, ((0, 0), (0, pad))) if pad > 0 else x


def prepare_params(w1, b1, bn1, w2, b2, bn2, wp):
    """Fold BN, pad narrow columns to 128 lanes, pack [W2 | Wpred].  Call once."""
    hidden = w1.shape[1]
    ncls = w2.shape[1]
    cpad = max(_LANES, ((ncls + _LANES - 1) // _LANES) * _LANES)

    w1f, b1f = _fold_bn(w1, b1, *bn1)
    w2f, b2f = _fold_bn(w2, b2, *bn2)

    w2p = _pad_cols(w2f, cpad)
    wpp = _pad_cols(wp, cpad)
    wpk = jnp.concatenate([w2p, wpp], axis=1)           # (H, 2*Cpad)
    b1r = b1f.reshape(1, hidden)
    b2r = _pad_cols(b2f.reshape(1, ncls), cpad)          # (1, Cpad)
    return (w1f, b1r, wpk, b2r), cpad


def prepare_adjacency(src, dst, edge_mask, n):
    """Dense row-normalized (mean-aggr) masked adjacency, as bf16.  Call once
    per graph/mask.  A[v, u] = sum_e mask[e] / in_degree(v)."""
    deg = jnp.zeros((n,), jnp.float32).at[dst].add(1.0)
    a = jnp.zeros((n, n), jnp.float32).at[dst, src].add(edge_mask)
    a_norm = a / jnp.where(deg > 0, deg, 1.0)[:, None]
    return a_norm, a_norm.astype(jnp.bfloat16)


# ----------------------------------------------------------------------------
# Forward: one fused pallas_call, no wrapper-side per-call jnp ops
# ----------------------------------------------------------------------------
def ginnet_forward(a_bf16, h, prepped, cpad):
    w1, b1r, wpk, b2r = prepped
    n = h.shape[0]
    kernel = _make_kernel(_EPS_GIN, cpad)
    # Returns the lane-dense padded output (N, Cpad); padded cols are zero.
    return pl.pallas_call(
        kernel,
        out_shape=jax.ShapeDtypeStruct((n, cpad), jnp.float32),
        in_specs=[pl.BlockSpec(memory_space=pltpu.MemorySpace.VMEM)] * 6,
        out_specs=pl.BlockSpec(memory_space=pltpu.MemorySpace.VMEM),
    )(a_bf16, h, w1, b1r, wpk, b2r)


# ----------------------------------------------------------------------------
# Pure-JAX f32 reference (explicit BN, no reassociation / packing / bf16)
# ----------------------------------------------------------------------------
def ref_forward(a_norm, h, w1, b1, bn1, w2, b2, bn2, wp, bn_eps=1e-5):
    def bn(x, stats):
        gamma, beta, mean, var = stats
        return (x - mean) / jnp.sqrt(var + bn_eps) * gamma + beta

    z1 = (1.0 + _EPS_GIN) * h + a_norm @ h
    h1 = jnp.maximum(bn(z1 @ w1 + b1, bn1), 0.0)
    z2 = (1.0 + _EPS_GIN) * h1 + a_norm @ h1
    h2 = jnp.maximum(bn(z2 @ w2 + b2, bn2), 0.0)
    return 0.5 * (h1 @ wp + h2)


# ----------------------------------------------------------------------------
# Main
# ----------------------------------------------------------------------------
if __name__ == "__main__":
    N = 128           # num_nodes
    E = 512           # num_edges
    IN_DIM = 16
    HIDDEN = 32
    N_CLASSES = 8
    # embedding_dim = [IN_DIM, HIDDEN, N_CLASSES]  -> n_layers = 2

    key = jax.random.PRNGKey(0)
    (k_src, k_dst, k_h, k_w1, k_b1, k_w2, k_b2, k_wp,
     k_bn1, k_bn2) = jax.random.split(key, 10)

    # Deterministic random graph (DGL-style edge lists).
    src = jax.random.randint(k_src, (E,), 0, N)
    dst = jax.random.randint(k_dst, (E,), 0, N)

    # adj_mask1_train initialized to ones (spar_adj path of __init__).
    edge_mask = jnp.ones((E,), dtype=jnp.float32)

    a_norm_f32, a_bf16 = prepare_adjacency(src, dst, edge_mask, N)

    # Node features.
    h0 = jax.random.normal(k_h, (N, IN_DIM), jnp.float32)

    # Deterministic parameters (shapes from the module's __init__).
    w1 = jax.random.normal(k_w1, (IN_DIM, HIDDEN), jnp.float32) * 0.1
    b1 = jax.random.normal(k_b1, (HIDDEN,), jnp.float32) * 0.1
    w2 = jax.random.normal(k_w2, (HIDDEN, N_CLASSES), jnp.float32) * 0.1
    b2 = jax.random.normal(k_b2, (N_CLASSES,), jnp.float32) * 0.1
    wp = jax.random.normal(k_wp, (HIDDEN, N_CLASSES), jnp.float32) * 0.1  # no bias

    # Eval-mode BatchNorm stats/affine (non-trivial, to exercise the fold).
    def bn_stats(k, dim):
        g, bta, mu, var = jax.random.split(k, 4)
        return (1.0 + 0.1 * jax.random.normal(g, (dim,), jnp.float32),
                0.1 * jax.random.normal(bta, (dim,), jnp.float32),
                0.1 * jax.random.normal(mu, (dim,), jnp.float32),
                1.0 + 0.1 * jnp.abs(jax.random.normal(var, (dim,), jnp.float32)))

    bn1 = bn_stats(k_bn1, HIDDEN)
    bn2 = bn_stats(k_bn2, N_CLASSES)

    # One-time prep (BN fold, lane padding, [W2 | Wpred] packing).
    prepped, cpad = prepare_params(w1, b1, bn1, w2, b2, bn2, wp)

    out_pad = ginnet_forward(a_bf16, h0, prepped, cpad)
    out_pad = jax.block_until_ready(out_pad)
    out = out_pad[:, :N_CLASSES]   # slice only for the correctness check

    ref = ref_forward(a_norm_f32, h0, w1, b1, bn1, w2, b2, bn2, wp)
    assert out.shape == (N, N_CLASSES)
    # bf16 on the two A-matmuls -> looser tolerance than pure-f32.
    assert jnp.allclose(out, ref, atol=2e-2, rtol=2e-2), "mismatch vs reference"
    # padded columns must stay exactly zero (relu(0)*0.5 + 0)
    assert jnp.all(out_pad[:, N_CLASSES:] == 0.0)

    print("KERNEL_OK")
</pallas_src>

<mosaic_0001>
module attributes {stable_mosaic.version = 11 : i64} {
  func.func @kernel(%arg0: memref<128x128xbf16, #tpu.memory_space<vmem>>, %arg1: memref<128x16xf32, #tpu.memory_space<vmem>>, %arg2: memref<16x32xf32, #tpu.memory_space<vmem>>, %arg3: memref<1x32xf32, #tpu.memory_space<vmem>>, %arg4: memref<32x256xf32, #tpu.memory_space<vmem>>, %arg5: memref<1x128xf32, #tpu.memory_space<vmem>>, %arg6: memref<128x128xf32, #tpu.memory_space<vmem>>) attributes {dimension_semantics = [], scalar_prefetch = 0 : i64, scratch_operands = 0 : i64, tpu.core_type = #tpu.core_type<tc>} {
    %c0 = arith.constant 0 : index
    %c0_0 = arith.constant 0 : index
    %0 = vector.load %arg1[%c0, %c0_0] : memref<128x16xf32, #tpu.memory_space<vmem>>, vector<128x16xf32>
    %c0_1 = arith.constant 0 : index
    %c0_2 = arith.constant 0 : index
    %1 = vector.load %arg2[%c0_1, %c0_2] : memref<16x32xf32, #tpu.memory_space<vmem>>, vector<16x32xf32>
    %cst = arith.constant dense<0.000000e+00> : vector<128x32xf32>
    %2 = tpu.matmul %0, %1, %cst {dimension_numbers = #tpu.dot_dimension_numbers<[1], [0], [0], [1], [0, 0, 1, 1], [], []>} : vector<128x16xf32>, vector<16x32xf32>, vector<128x32xf32> -> vector<128x32xf32>
    %c0_3 = arith.constant 0 : index
    %c0_4 = arith.constant 0 : index
    %3 = vector.load %arg0[%c0_3, %c0_4] : memref<128x128xbf16, #tpu.memory_space<vmem>>, vector<128x128xbf16>
    %4 = arith.truncf %2 : vector<128x32xf32> to vector<128x32xbf16>
    %cst_5 = arith.constant dense<0.000000e+00> : vector<128x32xf32>
    %5 = tpu.matmul %3, %4, %cst_5 {dimension_numbers = #tpu.dot_dimension_numbers<[1], [0], [0], [1], [0, 0, 1, 1], [], []>} : vector<128x128xbf16>, vector<128x32xbf16>, vector<128x32xf32> -> vector<128x32xf32>
    %cst_6 = arith.constant 1.000000e+00 : f32
    %6 = vector.broadcast %cst_6 : f32 to vector<128x32xf32>
    %7 = arith.mulf %6, %2 : vector<128x32xf32>
    %8 = arith.addf %5, %7 : vector<128x32xf32>
    %c0_7 = arith.constant 0 : index
    %c0_8 = arith.constant 0 : index
    %9 = vector.load %arg3[%c0_7, %c0_8] : memref<1x32xf32, #tpu.memory_space<vmem>>, vector<1x32xf32>
    %10 = vector.broadcast %9 : vector<1x32xf32> to vector<128x32xf32>
    %11 = arith.addf %8, %10 : vector<128x32xf32>
    %cst_9 = arith.constant 0.000000e+00 : f32
    %12 = vector.broadcast %cst_9 : f32 to vector<128x32xf32>
    %13 = arith.maximumf %11, %12 : vector<128x32xf32>
    %c0_10 = arith.constant 0 : index
    %c0_11 = arith.constant 0 : index
    %14 = vector.load %arg4[%c0_10, %c0_11] : memref<32x256xf32, #tpu.memory_space<vmem>>, vector<32x256xf32>
    %cst_12 = arith.constant dense<0.000000e+00> : vector<128x256xf32>
    %15 = tpu.matmul %13, %14, %cst_12 {dimension_numbers = #tpu.dot_dimension_numbers<[1], [0], [0], [1], [0, 0, 1, 1], [], []>} : vector<128x32xf32>, vector<32x256xf32>, vector<128x256xf32> -> vector<128x256xf32>
    %16 = vector.extract_strided_slice %15 {offsets = [0, 0], sizes = [128, 128], strides = [1, 1]} : vector<128x256xf32> to vector<128x128xf32>
    %17 = vector.extract_strided_slice %15 {offsets = [0, 128], sizes = [128, 128], strides = [1, 1]} : vector<128x256xf32> to vector<128x128xf32>
    %c0_13 = arith.constant 0 : index
    %c0_14 = arith.constant 0 : index
    %18 = vector.load %arg0[%c0_13, %c0_14] : memref<128x128xbf16, #tpu.memory_space<vmem>>, vector<128x128xbf16>
    %19 = arith.truncf %16 : vector<128x128xf32> to vector<128x128xbf16>
    %cst_15 = arith.constant dense<0.000000e+00> : vector<128x128xf32>
    %20 = tpu.matmul %18, %19, %cst_15 {dimension_numbers = #tpu.dot_dimension_numbers<[1], [0], [0], [1], [0, 0, 1, 1], [], []>} : vector<128x128xbf16>, vector<128x128xbf16>, vector<128x128xf32> -> vector<128x128xf32>
    %cst_16 = arith.constant 1.000000e+00 : f32
    %21 = vector.broadcast %cst_16 : f32 to vector<128x128xf32>
    %22 = arith.mulf %21, %16 : vector<128x128xf32>
    %23 = arith.addf %20, %22 : vector<128x128xf32>
    %c0_17 = arith.constant 0 : index
    %c0_18 = arith.constant 0 : index
    %24 = vector.load %arg5[%c0_17, %c0_18] : memref<1x128xf32, #tpu.memory_space<vmem>>, vector<1x128xf32>
    %25 = vector.broadcast %24 : vector<1x128xf32> to vector<128x128xf32>
    %26 = arith.addf %23, %25 : vector<128x128xf32>
    %cst_19 = arith.constant 0.000000e+00 : f32
    %27 = vector.broadcast %cst_19 : f32 to vector<128x128xf32>
    %28 = arith.maximumf %26, %27 : vector<128x128xf32>
    %29 = arith.addf %17, %28 : vector<128x128xf32>
    %cst_20 = arith.constant 5.000000e-01 : f32
    %30 = vector.broadcast %cst_20 : f32 to vector<128x128xf32>
    %31 = arith.mulf %30, %29 : vector<128x128xf32>
    %c0_21 = arith.constant 0 : index
    %c0_22 = arith.constant 0 : index
    %32 = vector.load %arg6[%c0_21, %c0_22] : memref<128x128xf32, #tpu.memory_space<vmem>>, vector<128x128xf32>
    tpu.vector_store %arg6[%c0_21, %c0_22], %31 {strides = array<i32>} : memref<128x128xf32, #tpu.memory_space<vmem>>, vector<128x128xf32>,
    return
  }
}

</mosaic_0001>

<bundles_post_ra>
// kernel: tpu_custom_call.1
= control target key start
LH: loop header
LB: loop body
LE: loop exit
PB: predicated region body
PF: predicated region fallthrough
CT: control target
= control target key end

     0   :  { %vm43_vm0 = vcmask 130048   ;;  %s1520_s0 = inlined_call_operand.vmem [shape: bf16[128,128], index: 0, kind: input, shape index: {}]   ;;  %s1521_s1 = inlined_call_operand.vmem [shape: f32[128,16], index: 1, kind: input, shape index: {}]   ;;  %s1522_s2 = inlined_call_operand.vmem [shape: f32[16,32], index: 2, kind: input, shape index: {}]   ;;  %s1523_s3 = inlined_call_operand.vmem [shape: f32[1,32], index: 3, kind: input, shape index: {}]   ;;  %s1524_s4 = inlined_call_operand.vmem [shape: f32[32,256], index: 4, kind: input, shape index: {}]   ;;  %s1525_s5 = inlined_call_operand.vmem [shape: f32[1,128], index: 5, kind: input, shape index: {}]   ;;  %s1526_s6 = inlined_call_operand.hbm [shape: f32[128,128], index: 6, kind: output, shape index: {}]  }
   0x1   :  { %v42_v0 = vld [vmem:[%s1522_s2 + $0x8] sm:$0xff]  ;;  %v41_v1 = vld [vmem:[%s1522_s2] sm:$0xff]  ;;  %v27_v4 = vld [vmem:[%s1521_s1 + $0x10] sm:$0xff] }
   0x2   :  { %v25_v2 = vld [vmem:[%s1521_s1] sm:$0xff]  ;;  %963 = vmatprep.subr.mxu0 %v42_v0  ;;  %v26_v3 = vld [vmem:[%s1521_s1 + $0x8] sm:$0xff]  ;;  %v28_v5 = vld [vmem:[%s1521_s1 + $0x18] sm:$0xff] }
   0x3   :  { %967 = vmatprep.mubr.msk.f32.mxu0 %vm43_vm0, %v25_v2  ;;  %964 = vmatpush3.msra.mxu0 %v42_v0  ;;  %v29_v6 = vld [vmem:[%s1521_s1 + $0x20] sm:$0xff]  ;;  %v30_v7 = vld [vmem:[%s1521_s1 + $0x28] sm:$0xff]  ;;  %v31_v8 = vld [vmem:[%s1521_s1 + $0x30] sm:$0xff] }
   0x4   :  { %965 = vmatprep.subr.mxu0 %v41_v1 }
   0x5   :  { %966 = vmatpush3.msra.mxu0 %v41_v1 }
   0x6   :  { %968 = vmatmul.mubr.msk.f32.vlgmr.msra.gmra.mxu0 %vm43_vm0, %v26_v3 }
   0x7   :  { %970 = vmatprep.mubr.msk.f32.mxu0 %vm43_vm0, %v27_v4 }
   0xa   :  { %971 = vmatmul.mubr.msk.f32.gmra.mxu0 %vm43_vm0, %v28_v5 }
   0xb   :  { %973 = vmatprep.mubr.msk.f32.mxu0 %vm43_vm0, %v29_v6 }
   0xc   :  { %11 = vsyncpa [#allocation3], 0  ;;  %v32_v9 = vld [vmem:[%s1521_s1 + $0x38] sm:$0xff]  ;;  %v33_v10 = vld [vmem:[%s1521_s1 + $0x40] sm:$0xff]  ;;  %v1089_v58 = vmov 0.0   ;;  %vm453_vm1 = vcmask 261120  }
   0xd   :  { %v34_v11 = vld [vmem:[%s1521_s1 + $0x48] sm:$0xff]  ;;  %v35_v12 = vld [vmem:[%s1521_s1 + $0x50] sm:$0xff]  ;;  %v36_v13 = vld [vmem:[%s1521_s1 + $0x58] sm:$0xff] }
   0xe   :  { %974 = vmatmul.mubr.msk.f32.gmra.mxu0 %vm43_vm0, %v30_v7  ;;  %v37_v14 = vld [vmem:[%s1521_s1 + $0x60] sm:$0xff]  ;;  %v38_v15 = vld [vmem:[%s1521_s1 + $0x68] sm:$0xff]  ;;  %v39_v16 = vld [vmem:[%s1521_s1 + $0x70] sm:$0xff] }
   0xf   :  { %976 = vmatprep.mubr.msk.f32.mxu0 %vm43_vm0, %v31_v8  ;;  %v40_v17 = vld [vmem:[%s1521_s1 + $0x78] sm:$0xff]  ;;  %v1201_v18 = vld [vmem:[%s1520_s0] sm:$0xff]   ;;  %v451_v20 = vld [vmem:[%s1524_s4 + $0x30] sm:$0xff] }
  0x10   :  { %1007 = vmatprep.mubr.bf16.mxu1 %v1201_v18  ;;  %v452_v19 = vld [vmem:[%s1524_s4 + $0x38] sm:$0xff]  ;;  %v450_v21 = vld [vmem:[%s1524_s4 + $0x28] sm:$0xff]  ;;  %v449_v22 = vld [vmem:[%s1524_s4 + $0x20] sm:$0xff] }
  0x11   :  { %526 = vmatprep.subr.mxu0 %v452_v19  ;;  %v448_v23 = vld [vmem:[%s1524_s4 + $0x18] sm:$0xff]  ;;  %v447_v24 = vld [vmem:[%s1524_s4 + $0x10] sm:$0xff]  ;;  %v1270_v49 = vld [vmem:[%s1520_s0 + $0x8] sm:$0xff]  }
  0x12   :  { %977 = vmatmul.mubr.msk.f32.gmra.mxu0 %vm43_vm0, %v32_v9  ;;  %v1275_v50 = vld [vmem:[%s1520_s0 + $0x10] sm:$0xff]   ;;  %v1282_v51 = vld [vmem:[%s1520_s0 + $0x18] sm:$0xff]   ;;  %v1287_v52 = vld [vmem:[%s1520_s0 + $0x20] sm:$0xff]  }
  0x13   :  { %979 = vmatprep.mubr.msk.f32.mxu0 %vm43_vm0, %v33_v10  ;;  %527 = vmatpush1.msra.mxu0 %v451_v20  ;;  %v1294_v53 = vld [vmem:[%s1520_s0 + $0x28] sm:$0xff]   ;;  %v1299_v54 = vld [vmem:[%s1520_s0 + $0x30] sm:$0xff]   ;;  %v1306_v55 = vld [vmem:[%s1520_s0 + $0x38] sm:$0xff]  }
  0x14   :  { %528 = vmatprep.subr.mxu0 %v450_v21  ;;  %v446_v56 = vld [vmem:[%s1524_s4 + $0x8] sm:$0xff]  ;;  %v445_v57 = vld [vmem:[%s1524_s4] sm:$0xff] }
  0x15   :  { %529 = vmatpush1.msra.mxu0 %v449_v22  ;;  %v1320_v62 = vld [vmem:[%s1523_s3] ss:$0 sm:$0xff] }
  0x16   :  { %980 = vmatmul.mubr.msk.f32.gmra.mxu0 %vm43_vm0, %v34_v11  ;;  %530 = vmatprep.subr.mxu0 %v448_v23 }
  0x17   :  { %982 = vmatprep.mubr.msk.f32.mxu0 %vm43_vm0, %v35_v12  ;;  %531 = vmatpush1.msra.mxu0 %v447_v24 }
  0x18   :  { %532 = vmatprep.subr.mxu0 %v446_v56 }
  0x19   :  { %533 = vmatpush1.msra.mxu0 %v445_v57 }
  0x1a   :  { %983 = vmatmul.mubr.msk.f32.gmra.mxu0 %vm43_vm0, %v36_v13 }
  0x1b   :  { %985 = vmatprep.mubr.msk.f32.mxu0 %vm43_vm0, %v37_v14 }
  0x1e   :  { %986 = vmatmul.mubr.msk.f32.gmra.mxu0 %vm43_vm0, %v38_v15 }
  0x1f   :  { %988 = vmatprep.mubr.msk.f32.mxu0 %vm43_vm0, %v39_v16 }
  0x22   :  { %989 = vmatmul.mubr.msk.f32.gmra.mxu0 %vm43_vm0, %v40_v17 }
  0x23   :  { %566 = vmatprep.mubr.f32.mxu0 %v1089_v58 }
  0xc6   :  { %v1222_v25 = vpop.f32.mrf.mxu0 }
  0xc8   :  { %v158_v26 = vpop.f32.mrf.mxu0 }
  0xc9   :  { %v253_v48 = vpack.c.bf16 %v1222_v25, %v158_v26 }
  0xca   :  { %v1224_v27 = vpop.f32.mrf.mxu0 }
  0xcc   :  { %v1226_v28 = vpop.f32.mrf.mxu0 }
  0xcd   :  { %v254_v47 = vpack.c.bf16 %v1224_v27, %v1226_v28 }
  0xce   :  { %v1228_v29 = vpop.f32.mrf.mxu0 }
  0xd0   :  { %v1230_v30 = vpop.f32.mrf.mxu0 }
  0xd1   :  { %v255_v46 = vpack.c.bf16 %v1228_v29, %v1230_v30 }
  0xd2   :  { %v1232_v31 = vpop.f32.mrf.mxu0 }
  0xd4   :  { %v1234_v32 = vpop.f32.mrf.mxu0 }
  0xd5   :  { %v256_v45 = vpack.c.bf16 %v1232_v31, %v1234_v32 }
  0xd6   :  { %v1236_v33 = vpop.f32.mrf.mxu0 }
  0xd8   :  { %v1238_v34 = vpop.f32.mrf.mxu0 }
  0xd9   :  { %v257_v44 = vpack.c.bf16 %v1236_v33, %v1238_v34 }
  0xda   :  { %v1240_v35 = vpop.f32.mrf.mxu0 }
  0xdc   :  { %v1242_v36 = vpop.f32.mrf.mxu0 }
  0xdd   :  { %v258_v43 = vpack.c.bf16 %v1240_v35, %v1242_v36 }
  0xde   :  { %v1244_v37 = vpop.f32.mrf.mxu0 }
  0xe0   :  { %v1246_v38 = vpop.f32.mrf.mxu0 }
  0xe1   :  { %v259_v42 = vpack.c.bf16 %v1244_v37, %v1246_v38 }
  0xe2   :  { %v1248_v39 = vpop.f32.mrf.mxu0 }
  0xe4   :  { %v1250_v40 = vpop.f32.mrf.mxu0 }
  0xe5   :  { %v260_v41 = vpack.c.bf16 %v1248_v39, %v1250_v40 }
  0xe7   :  { %991 = vmatprep.subr.bf16.mxu1 %v260_v41 }
  0xe8   :  { %992 = vmatpush3.bf16.msra.mxu1 %v260_v41 }
  0xe9   :  { %993 = vmatprep.subr.bf16.mxu1 %v259_v42 }
  0xec   :  { %994 = vmatpush3.bf16.msra.mxu1 %v259_v42 }
  0xed   :  { %995 = vmatprep.subr.bf16.mxu1 %v258_v43 }
  0xf0   :  { %996 = vmatpush3.bf16.msra.mxu1 %v258_v43 }
  0xf1   :  { %997 = vmatprep.subr.bf16.mxu1 %v257_v44 }
  0xf4   :  { %998 = vmatpush3.bf16.msra.mxu1 %v257_v44 }
  0xf5   :  { %999 = vmatprep.subr.bf16.mxu1 %v256_v45 }
  0xf8   :  { %1000 = vmatpush3.bf16.msra.mxu1 %v256_v45 }
  0xf9   :  { %1001 = vmatprep.subr.bf16.mxu1 %v255_v46 }
  0xfc   :  { %1002 = vmatpush3.bf16.msra.mxu1 %v255_v46 }
  0xfd   :  { %1003 = vmatprep.subr.bf16.mxu1 %v254_v47 }
 0x100   :  { %1004 = vmatpush3.bf16.msra.mxu1 %v254_v47 }
 0x101   :  { %1005 = vmatprep.subr.bf16.mxu1 %v253_v48 }
 0x104   :  { %1006 = vmatpush3.bf16.msra.mxu1 %v253_v48 }
 0x107   :  { %1008 = vmatmul.mubr.bf16.vlgmr.msra.gmra.mxu1 %v1270_v49 }
 0x108   :  { %1011 = vmatprep.mubr.bf16.mxu1 %v1275_v50 }
 0x10f   :  { %1012 = vmatmul.mubr.bf16.gmra.mxu1 %v1282_v51 }
 0x110   :  { %1015 = vmatprep.mubr.bf16.mxu1 %v1287_v52 }
 0x117   :  { %1016 = vmatmul.mubr.bf16.gmra.mxu1 %v1294_v53 }
 0x118   :  { %1019 = vmatprep.mubr.bf16.mxu1 %v1299_v54 }
 0x11f   :  { %1020 = vmatmul.mubr.bf16.gmra.mxu1 %v1306_v55 }
 0x120   :  { %1039 = vmatprep.mubr.bf16.mxu1 %v1201_v18 }
 0x1c7   :  { %v1009_v59 = vpop.f32.mrf.mxu1 }
 0x1c8   :  { %v352_v2 = vadd.f32 %v1009_v59, %v1226_v28 }
 0x1c9   :  { %v343_v60 = vpop.f32.mrf.mxu1 }
 0x1ca   :  { %v344_v61 = vadd.f32 %v343_v60, %v158_v26  ;;  %v415_v8 = vadd.f32 %v1320_v62, %v352_v2 }
 0x1cb   :  { %v1010_v63 = vpop.f32.mrf.mxu1 }
 0x1cc   :  { %v413_v0 = vadd.f32 %v1320_v62, %v344_v61  ;;  %v355_v9 = vadd.f32 %v1010_v63, %v1224_v27  ;;  %v431_v12 = vmax.f32 %v415_v8, 0.0 }
 0x1cd   :  { %v346_v1 = vpop.f32.mrf.mxu1 }
 0x1ce   :  { %v429_v3 = vmax.f32 %v413_v0, 0.0  ;;  %v347_v4 = vadd.f32 %v1222_v25, %v346_v1  ;;  %v416_v13 = vadd.f32 %v1320_v62, %v355_v9 }
 0x1cf   :  { %v1013_v5 = vpop.f32.mrf.mxu1 }
 0x1d0   :  { %v414_v6 = vadd.f32 %v1320_v62, %v347_v4  ;;  %896 = vmatmul.mubr.msk.f32.vlgmr.msra.gmra.mxu0 %vm453_vm1, %v429_v3  ;;  %v432_v16 = vmax.f32 %v416_v13, 0.0  ;;  %v368_v20 = vadd.f32 %v1013_v5, %v1234_v32 }
 0x1d1   :  { %v359_v7 = vpop.f32.mrf.mxu1  ;;  %572 = vmatprep.mubr.f32.mxu0 %v1089_v58 }
 0x1d2   :  { %v430_v10 = vmax.f32 %v414_v6, 0.0  ;;  %v360_v14 = vadd.f32 %v359_v7, %v1230_v30  ;;  %v419_v24 = vadd.f32 %v1320_v62, %v368_v20 }
 0x1d3   :  { %v1014_v11 = vpop.f32.mrf.mxu1 }
 0x1d4   :  { %897 = vmatmul.mubr.msk.f32.gmra.mxu0 %vm453_vm1, %v430_v10  ;;  %v417_v17 = vadd.f32 %v1320_v62, %v360_v14  ;;  %v371_v25 = vadd.f32 %v1014_v11, %v1232_v31  ;;  %v435_v28 = vmax.f32 %v419_v24, 0.0 }
 0x1d5   :  { %578 = vmatprep.mubr.f32.mxu0 %v1089_v58  ;;  %v362_v15 = vpop.f32.mrf.mxu1 }
 0x1d6   :  { %v363_v18 = vadd.f32 %v1228_v29, %v362_v15  ;;  %v433_v21 = vmax.f32 %v417_v17, 0.0  ;;  %v420_v29 = vadd.f32 %v1320_v62, %v371_v25 }
 0x1d7   :  { %v1017_v19 = vpop.f32.mrf.mxu1 }
 0x1d8   :  { %898 = vmatmul.mubr.msk.f32.gmra.mxu0 %vm453_vm1, %v431_v12  ;;  %v418_v22 = vadd.f32 %v1320_v62, %v363_v18  ;;  %v436_v41 = vmax.f32 %v420_v29, 0.0  ;;  %v384_v44 = vadd.f32 %v1017_v19, %v1242_v36 }
 0x1d9   :  { %584 = vmatprep.mubr.f32.mxu0 %v1089_v58  ;;  %v375_v23 = vpop.f32.mrf.mxu1 }
 0x1da   :  { %v434_v26 = vmax.f32 %v418_v22, 0.0  ;;  %v376_v30 = vadd.f32 %v375_v23, %v1238_v34  ;;  %v423_v47 = vadd.f32 %v1320_v62, %v384_v44 }
 0x1db   :  { %v1018_v27 = vpop.f32.mrf.mxu1 }
 0x1dc   :  { %899 = vmatmul.mubr.msk.f32.gmra.mxu0 %vm453_vm1, %v432_v16  ;;  %v421_v42 = vadd.f32 %v1320_v62, %v376_v30  ;;  %v387_v48 = vadd.f32 %v1018_v27, %v1240_v35  ;;  %v439_v57 = vmax.f32 %v423_v47, 0.0 }
 0x1dd   :  { %590 = vmatprep.mubr.f32.mxu0 %v1089_v58  ;;  %v378_v32 = vpop.f32.mrf.mxu1 }
 0x1de   :  { %v379_v31 = vadd.f32 %v1236_v33, %v378_v32  ;;  %v437_v45 = vmax.f32 %v421_v42, 0.0  ;;  %v424_v36 = vadd.f32 %v1320_v62, %v387_v48 }
 0x1df   :  { %v1021_v43 = vpop.f32.mrf.mxu1 }
 0x1e0   :  { %900 = vmatmul.mubr.msk.f32.gmra.mxu0 %vm453_vm1, %v433_v21  ;;  %v422_v34 = vadd.f32 %v1320_v62, %v379_v31  ;;  %v440_v61 = vmax.f32 %v424_v36, 0.0  ;;  %v400_v0 = vadd.f32 %v1021_v43, %v1250_v40 }
 0x1e1   :  { %596 = vmatprep.mubr.f32.mxu0 %v1089_v58  ;;  %v391_v46 = vpop.f32.mrf.mxu1 }
 0x1e2   :  { %v438_v33 = vmax.f32 %v422_v34, 0.0  ;;  %v392_v59 = vadd.f32 %v391_v46, %v1246_v38  ;;  %v427_v38 = vadd.f32 %v1320_v62, %v400_v0 }
 0x1e3   :  { %v1022_v56 = vpop.f32.mrf.mxu1 }
 0x1e4   :  { %901 = vmatmul.mubr.msk.f32.gmra.mxu0 %vm453_vm1, %v434_v26  ;;  %v425_v63 = vadd.f32 %v1320_v62, %v392_v59  ;;  %v403_v3 = vadd.f32 %v1022_v56, %v1248_v39  ;;  %v1469_v56 = vld [vmem:[%s1525_s5] ss:$0 sm:$0xff]  ;;  %s1090_s5 = smov [#allocation2]  }
 0x1e5   :  { %602 = vmatprep.mubr.f32.mxu0 %v1089_v58  ;;  %v394_v60 = vpop.f32.mrf.mxu1  ;;  %s860_s14 = sshll.u32 %s1090_s5, 4  ;;  %s861_s14 = int_to_ptr.vmem [resolvable:$true] %s860_s14 }
 0x1e6   :  { %v395_v35 = vadd.f32 %v1244_v37, %v394_v60  ;;  %v441_v1 = vmax.f32 %v425_v63, 0.0  ;;  %v443_v37 = vmax.f32 %v427_v38, 0.0  ;;  %v428_v5 = vadd.f32 %v1320_v62, %v403_v3  ;;  %s1067_s1 = scalar_lea.vmem %s861_s14, 2048  ;;  %p1072_p1 = scmp.lt.s32.totalorder %s861_s14, %s861_s14 }
 0x1e7   :  { %p1068_p0 = scmp.ne.s32.totalorder %s861_s14, %s1067_s1  ;;  %p1073_p2 = scmp.lt.s32.totalorder %s1067_s1, %s1067_s1 }
 0x1e8   :  { %902 = vmatmul.mubr.msk.f32.gmra.mxu0 %vm453_vm1, %v435_v28  ;;  %v426_v2 = vadd.f32 %v1320_v62, %v395_v35  ;;  %v444_v40 = vmax.f32 %v428_v5, 0.0 }
 0x1e9   :  { %608 = vmatprep.mubr.f32.mxu0 %v1089_v58  ;;  %p1074_p3 = por %p1073_p2, %p1072_p1 }
 0x1ea   :  { %v442_v4 = vmax.f32 %v426_v2, 0.0 }
 0x1eb   :  { %p1075_p4 = pnand %p1074_p3, %p1068_p0 }
 0x1ec   :  { %903 = vmatmul.mubr.msk.f32.gmra.mxu0 %vm453_vm1, %v436_v41 }
 0x1ed   :  { %614 = vmatprep.mubr.f32.mxu0 %v1089_v58 }
 0x1f0   :  { %904 = vmatmul.mubr.msk.f32.gmra.mxu0 %vm453_vm1, %v437_v45 }
 0x1f1   :  { %620 = vmatprep.mubr.f32.mxu0 %v1089_v58 }
 0x1f4   :  { %905 = vmatmul.mubr.msk.f32.gmra.mxu0 %vm453_vm1, %v438_v33 }
 0x1f5   :  { %626 = vmatprep.mubr.f32.mxu0 %v1089_v58 }
 0x1f8   :  { %906 = vmatmul.mubr.msk.f32.gmra.mxu0 %vm453_vm1, %v439_v57 }
 0x1f9   :  { %632 = vmatprep.mubr.f32.mxu0 %v1089_v58 }
 0x1fc   :  { %907 = vmatmul.mubr.msk.f32.gmra.mxu0 %vm453_vm1, %v440_v61 }
 0x1fd   :  { %638 = vmatprep.mubr.f32.mxu0 %v1089_v58 }
 0x200   :  { %908 = vmatmul.mubr.msk.f32.gmra.mxu0 %vm453_vm1, %v441_v1 }
 0x201   :  { %644 = vmatprep.mubr.f32.mxu0 %v1089_v58 }
 0x204   :  { %909 = vmatmul.mubr.msk.f32.gmra.mxu0 %vm453_vm1, %v442_v4 }
 0x205   :  { %650 = vmatprep.mubr.f32.mxu0 %v1089_v58 }
 0x208   :  { %910 = vmatmul.mubr.msk.f32.gmra.mxu0 %vm453_vm1, %v443_v37 }
 0x209   :  { %656 = vmatprep.mubr.f32.mxu0 %v1089_v58 }
 0x20c   :  { %911 = vmatmul.mubr.msk.f32.gmra.mxu0 %vm453_vm1, %v444_v40 }
 0x290   :  { %v1384_v6 = vpop.f32.mrf.mxu0 }
 0x292   :  { %v1386_v7 = vpop.f32.mrf.mxu0 }
 0x294   :  { %v1388_v39 = vpop.f32.mrf.mxu0 }
 0x295   :  { %v663_v48 = vpack.c.bf16 %v1388_v39, %v1384_v6 }
 0x296   :  { %v1390_v8 = vpop.f32.mrf.mxu0 }
 0x298   :  { %v580_v9 = vpop.f32.mrf.mxu0 }
 0x29a   :  { %v1392_v10 = vpop.f32.mrf.mxu0 }
 0x29c   :  { %v1394_v11 = vpop.f32.mrf.mxu0 }
 0x29d   :  { %v664_v47 = vpack.c.bf16 %v1394_v11, %v580_v9 }
 0x29e   :  { %v1396_v62 = vpop.f32.mrf.mxu0 }
 0x2a0   :  { %v1398_v12 = vpop.f32.mrf.mxu0 }
 0x2a2   :  { %v1400_v58 = vpop.f32.mrf.mxu0 }
 0x2a4   :  { %v1402_v13 = vpop.f32.mrf.mxu0 }
 0x2a5   :  { %v665_v46 = vpack.c.bf16 %v1402_v13, %v1398_v12 }
 0x2a6   :  { %v1404_v14 = vpop.f32.mrf.mxu0 }
 0x2a8   :  { %v1406_v15 = vpop.f32.mrf.mxu0 }
 0x2aa   :  { %v1408_v16 = vpop.f32.mrf.mxu0 }
 0x2ac   :  { %v1410_v17 = vpop.f32.mrf.mxu0 }
 0x2ad   :  { %v666_v34 = vpack.c.bf16 %v1410_v17, %v1406_v15 }
 0x2ae   :  { %v1412_v18 = vpop.f32.mrf.mxu0 }
 0x2b0   :  { %v1414_v19 = vpop.f32.mrf.mxu0 }
 0x2b2   :  { %v1416_v20 = vpop.f32.mrf.mxu0 }
 0x2b4   :  { %v1418_v21 = vpop.f32.mrf.mxu0 }
 0x2b5   :  { %v667_v45 = vpack.c.bf16 %v1418_v21, %v1414_v19 }
 0x2b6   :  { %v1420_v22 = vpop.f32.mrf.mxu0 }
 0x2b8   :  { %v1422_v23 = vpop.f32.mrf.mxu0 }
 0x2ba   :  { %v1424_v24 = vpop.f32.mrf.mxu0 }
 0x2bc   :  { %v1426_v25 = vpop.f32.mrf.mxu0 }
 0x2bd   :  { %v668_v44 = vpack.c.bf16 %v1426_v25, %v1422_v23 }
 0x2be   :  { %v1428_v26 = vpop.f32.mrf.mxu0 }
 0x2c0   :  { %v1430_v27 = vpop.f32.mrf.mxu0 }
 0x2c2   :  { %v1432_v28 = vpop.f32.mrf.mxu0 }
 0x2c4   :  { %v1434_v29 = vpop.f32.mrf.mxu0 }
 0x2c5   :  { %v669_v43 = vpack.c.bf16 %v1434_v29, %v1430_v27 }
 0x2c6   :  { %v1436_v30 = vpop.f32.mrf.mxu0 }
 0x2c8   :  { %v1438_v32 = vpop.f32.mrf.mxu0 }
 0x2ca   :  { %v1440_v41 = vpop.f32.mrf.mxu0 }
 0x2cc   :  { %v1442_v42 = vpop.f32.mrf.mxu0 }
 0x2cd   :  { %v670_v31 = vpack.c.bf16 %v1442_v42, %v1438_v32 }
 0x2cf   :  { %1023 = vmatprep.subr.bf16.mxu1 %v670_v31 }
 0x2d0   :  { %1024 = vmatpush3.bf16.msra.mxu1 %v670_v31 }
 0x2d1   :  { %1025 = vmatprep.subr.bf16.mxu1 %v669_v43 }
 0x2d4   :  { %1026 = vmatpush3.bf16.msra.mxu1 %v669_v43 }
 0x2d5   :  { %1027 = vmatprep.subr.bf16.mxu1 %v668_v44 }
 0x2d8   :  { %1028 = vmatpush3.bf16.msra.mxu1 %v668_v44 }
 0x2d9   :  { %1029 = vmatprep.subr.bf16.mxu1 %v667_v45 }
 0x2dc   :  { %1030 = vmatpush3.bf16.msra.mxu1 %v667_v45 }
 0x2dd   :  { %1031 = vmatprep.subr.bf16.mxu1 %v666_v34 }
 0x2e0   :  { %1032 = vmatpush3.bf16.msra.mxu1 %v666_v34 }
 0x2e1   :  { %1033 = vmatprep.subr.bf16.mxu1 %v665_v46 }
 0x2e4   :  { %1034 = vmatpush3.bf16.msra.mxu1 %v665_v46 }
 0x2e5   :  { %1035 = vmatprep.subr.bf16.mxu1 %v664_v47 }
 0x2e8   :  { %1036 = vmatpush3.bf16.msra.mxu1 %v664_v47 }
 0x2e9   :  { %1037 = vmatprep.subr.bf16.mxu1 %v663_v48 }
 0x2ec   :  { %1038 = vmatpush3.bf16.msra.mxu1 %v663_v48 }
 0x2ef   :  { %1040 = vmatmul.mubr.bf16.vlgmr.msra.gmra.mxu1 %v1270_v49 }
 0x2f0   :  { %1043 = vmatprep.mubr.bf16.mxu1 %v1275_v50 }
 0x2f7   :  { %1044 = vmatmul.mubr.bf16.gmra.mxu1 %v1282_v51 }
 0x2f8   :  { %1047 = vmatprep.mubr.bf16.mxu1 %v1287_v52 }
 0x2ff   :  { %1048 = vmatmul.mubr.bf16.gmra.mxu1 %v1294_v53 }
 0x300   :  { %1051 = vmatprep.mubr.bf16.mxu1 %v1299_v54 }
 0x307   :  { %1052 = vmatmul.mubr.bf16.gmra.mxu1 %v1306_v55 }
 0x3af   :  { %v1041_v33 = vpop.f32.mrf.mxu1 }
 0x3b0   :  { %v714_v57 = vadd.f32 %v1041_v33, %v580_v9 }
 0x3b1   :  { %v705_v49 = vpop.f32.mrf.mxu1 }
 0x3b2   :  { %v777_v50 = vadd.f32 %v1469_v56, %v714_v57  ;;  %v706_v51 = vadd.f32 %v705_v49, %v1384_v6 }
 0x3b3   :  { %v1042_v36 = vpop.f32.mrf.mxu1 }
 0x3b4   :  { %v793_v52 = vmax.f32 %v777_v50, 0.0  ;;  %v775_v53 = vadd.f32 %v1469_v56, %v706_v51  ;;  %v717_v54 = vadd.f32 %v1042_v36, %v1394_v11 }
 0x3b5   :  { %v708_v59 = vpop.f32.mrf.mxu1 }
 0x3b6   :  { %v809_v55 = vadd.f32 %v793_v52, %v1392_v10  ;;  %v791_v60 = vmax.f32 %v775_v53, 0.0  ;;  %v778_v61 = vadd.f32 %v1469_v56, %v717_v54  ;;  %v709_v63 = vadd.f32 %v708_v59, %v1388_v39 }
 0x3b7   :  { %v1045_v35 = vpop.f32.mrf.mxu1 }
 0x3b8   :  { %v825_v0 = vmul.f32 0.5, %v809_v55  ;;  %v807_v1 = vadd.f32 %v791_v60, %v1386_v7  ;;  %v794_v2 = vmax.f32 %v778_v61, 0.0  ;;  %v776_v38 = vadd.f32 %v1469_v56, %v709_v63 }
 0x3b9   :  { %v730_v3 = vadd.f32 %v1045_v35, %v1406_v15  ;;  %v721_v4 = vpop.f32.mrf.mxu1 }
 0x3ba   :  { %841 = vst [vmem:[#allocation2 + $0x10] sm:$0xff] %v825_v0  ;;  %v823_v37 = vmul.f32 0.5, %v807_v1  ;;  %v810_v5 = vadd.f32 %v794_v2, %v1396_v62  ;;  %v792_v40 = vmax.f32 %v776_v38, 0.0  ;;  %v722_v6 = vadd.f32 %v721_v4, %v1398_v12 }
 0x3bb   :  { %v781_v9 = vadd.f32 %v1469_v56, %v730_v3  ;;  %v1046_v39 = vpop.f32.mrf.mxu1 }
 0x3bc   :  { %839 = vst [vmem:[#allocation2] sm:$0xff] %v823_v37  ;;  %v826_v10 = vmul.f32 0.5, %v810_v5  ;;  %v808_v7 = vadd.f32 %v792_v40, %v1390_v8  ;;  %v779_v11 = vadd.f32 %v1469_v56, %v722_v6  ;;  %v733_v31 = vadd.f32 %v1046_v39, %v1410_v17 }
 0x3bd   :  { %v797_v15 = vmax.f32 %v781_v9, 0.0  ;;  %v724_v43 = vpop.f32.mrf.mxu1 }
 0x3be   :  { %842 = vst [vmem:[#allocation2 + $0x18] sm:$0xff] %v826_v10  ;;  %v824_v44 = vmul.f32 0.5, %v808_v7  ;;  %v795_v45 = vmax.f32 %v779_v11, 0.0  ;;  %v782_v62 = vadd.f32 %v1469_v56, %v733_v31  ;;  %v725_v12 = vadd.f32 %v724_v43, %v1402_v13  ;;  %v660_v43 = vpop.f32.mrf.mxu0 }
 0x3bf   :  { %v813_v34 = vadd.f32 %v797_v15, %v1408_v16  ;;  %v1049_v46 = vpop.f32.mrf.mxu1 }
 0x3c0   :  { %840 = vst [vmem:[#allocation2 + $0x8] sm:$0xff] %v824_v44  ;;  %v811_v47 = vadd.f32 %v795_v45, %v1400_v58  ;;  %v798_v8 = vmax.f32 %v782_v62, 0.0  ;;  %v780_v48 = vadd.f32 %v1469_v56, %v725_v12  ;;  %v746_v17 = vadd.f32 %v1049_v46, %v1422_v23 }
 0x3c1   :  { %v829_v33 = vmul.f32 0.5, %v813_v34  ;;  %v737_v57 = vpop.f32.mrf.mxu1 }
 0x3c2   :  { %v827_v49 = vmul.f32 0.5, %v811_v47  ;;  %v814_v50 = vadd.f32 %v798_v8, %v1412_v18  ;;  %v796_v51 = vmax.f32 %v780_v48, 0.0  ;;  %v785_v36 = vadd.f32 %v1469_v56, %v746_v17 }
 0x3c3   :  { %845 = vst [vmem:[#allocation2 + $0x30] sm:$0xff] %v829_v33  ;;  %v738_v13 = vadd.f32 %v737_v57, %v1414_v19  ;;  %v1050_v16 = vpop.f32.mrf.mxu1 }
 0x3c4   :  { %843 = vst [vmem:[#allocation2 + $0x20] sm:$0xff] %v827_v49  ;;  %v830_v52 = vmul.f32 0.5, %v814_v50  ;;  %v812_v58 = vadd.f32 %v796_v51, %v1404_v14  ;;  %v801_v53 = vmax.f32 %v785_v36, 0.0  ;;  %v749_v54 = vadd.f32 %v1050_v16, %v1426_v25 }
 0x3c5   :  { %v783_v23 = vadd.f32 %v1469_v56, %v738_v13  ;;  %v740_v59 = vpop.f32.mrf.mxu1 }
 0x3c6   :  { %846 = vst [vmem:[#allocation2 + $0x38] sm:$0xff] %v830_v52  ;;  %v828_v55 = vmul.f32 0.5, %v812_v58  ;;  %v817_v18 = vadd.f32 %v801_v53, %v1424_v24  ;;  %v786_v60 = vadd.f32 %v1469_v56, %v749_v54  ;;  %v741_v61 = vadd.f32 %v740_v59, %v1418_v21 }
 0x3c7   :  { %v799_v19 = vmax.f32 %v783_v23, 0.0  ;;  %v1053_v63 = vpop.f32.mrf.mxu1 }
 0x3c8   :  { %844 = vst [vmem:[#allocation2 + $0x28] sm:$0xff] %v828_v55  ;;  %v833_v35 = vmul.f32 0.5, %v817_v18  ;;  %v802_v0 = vmax.f32 %v786_v60, 0.0  ;;  %v784_v14 = vadd.f32 %v1469_v56, %v741_v61  ;;  %v762_v25 = vadd.f32 %v1053_v63, %v1438_v32 }
 0x3c9   :  { %v815_v1 = vadd.f32 %v799_v19, %v1416_v20  ;;  %v753_v2 = vpop.f32.mrf.mxu1 }
 0x3ca   :  { %849 = vst [vmem:[#allocation2 + $0x50] sm:$0xff] %v833_v35  ;;  %v818_v38 = vadd.f32 %v802_v0, %v1428_v26  ;;  %v800_v24 = vmax.f32 %v784_v14, 0.0  ;;  %v789_v3 = vadd.f32 %v1469_v56, %v762_v25  ;;  %v754_v21 = vadd.f32 %v753_v2, %v1430_v27 }
 0x3cb   :  { %v831_v4 = vmul.f32 0.5, %v815_v1  ;;  %v1054_v37 = vpop.f32.mrf.mxu1 }
 0x3cc   :  { %v834_v5 = vmul.f32 0.5, %v818_v38  ;;  %v816_v40 = vadd.f32 %v800_v24, %v1420_v22  ;;  %v805_v6 = vmax.f32 %v789_v3, 0.0  ;;  %v787_v9 = vadd.f32 %v1469_v56, %v754_v21 }
 0x3cd   :  { %847 = vst [vmem:[#allocation2 + $0x40] sm:$0xff] %v831_v4  ;;  %v765_v20 = vadd.f32 %v1054_v37, %v1442_v42  ;;  %v756_v32 = vpop.f32.mrf.mxu1 }
 0x3ce   :  { %850 = vst [vmem:[#allocation2 + $0x58] sm:$0xff] %v834_v5  ;;  %v832_v39 = vmul.f32 0.5, %v816_v40  ;;  %v821_v26 = vadd.f32 %v805_v6, %v1440_v41  ;;  %v803_v10 = vmax.f32 %v787_v9, 0.0  ;;  %v757_v7 = vadd.f32 %v756_v32, %v1434_v29 }
 0x3cf   :  { %v790_v27 = vadd.f32 %v1469_v56, %v765_v20 }
 0x3d0   :  { %848 = vst [vmem:[#allocation2 + $0x48] sm:$0xff] %v832_v39  ;;  %v837_v11 = vmul.f32 0.5, %v821_v26  ;;  %v819_v22 = vadd.f32 %v803_v10, %v1432_v28  ;;  %v788_v31 = vadd.f32 %v1469_v56, %v757_v7 }
 0x3d1   :  { %v806_v15 = vmax.f32 %v790_v27, 0.0 }
 0x3d2   :  { %853 = vst [vmem:[#allocation2 + $0x70] sm:$0xff] %v837_v11  ;;  %v835_v42 = vmul.f32 0.5, %v819_v22  ;;  %v804_v44 = vmax.f32 %v788_v31, 0.0 }
 0x3d3   :  { %v822_v45 = vadd.f32 %v806_v15, %v660_v43 }
 0x3d4   :  { %851 = vst [vmem:[#allocation2 + $0x60] sm:$0xff] %v835_v42  ;;  %v820_v41 = vadd.f32 %v804_v44, %v1436_v30 }
 0x3d5   :  { %v838_v29 = vmul.f32 0.5, %v822_v45 }
 0x3d6   :  { %v836_v62 = vmul.f32 0.5, %v820_v41 }
 0x3d7   :  { %854 = vst [vmem:[#allocation2 + $0x78] sm:$0xff] %v838_v29 }
 0x3d8   :  { %852 = vst [vmem:[#allocation2 + $0x68] sm:$0xff] %v836_v62 }
 0x3d9   :  { %1078 = shalt.err (!%p1075_p4)
}
 0x3da   :  { %s1091_s15 = smov 128   ;;  %s1092_s16 = smov 8  }
 0x3db   :  { %866 = dma.vmem_to_hbm [thread:$0]  %s861_s14, 2048, %s1526_s6, [#allocation3], %s1091_s15, %s1091_s15, %s1092_s16  }
 0x3dc   :  { %1087 = dma.done.wait [#allocation3], 2048  }
 0x3dd   :  { %1088 = vsyncadd [#allocation3], 4294965248 }
 0x3de   :  { %870 = vsyncpa [#allocation3], 1 }

</bundles_post_ra>
